<compile_context>
chip_gen: v7x
topology: tpu7x:2x2x1
jax: 0.10.0
libtpu: 0.0.40
codegen_flags: <defaults>
</compile_context>

<pallas_src>
import functools

import jax
import jax.numpy as jnp
from jax.experimental import pallas as pl
from jax.experimental.pallas import tpu as pltpu


# ----------------------------- Pallas kernel --------------------------------
def _projection_kernel(x_ref, emb_ref, font_ref, char_ref, *, tb: int):
    """One grid step = `tb` batch rows x one HW lane tile.

    x_ref    : (tb, C, hw_t)   feature-map slab (compute dtype, e.g. bf16)
    emb_ref  : (tb, 2, C)      stacked [font, char] embeddings
    font_ref : (tb, hw_t) f32  font projection scores (dense block)
    char_ref : (tb, hw_t) f32  char projection scores (dense block)
    """
    font_rows = []
    char_rows = []
    # Static unroll over the (<= 8) batch rows of this block. Each row is a
    # plain 2-D (2, C) @ (C, hw_t) MXU matmul with f32 accumulation; both
    # heads share the single read of x_b. activ='none' -> identity.
    for b in range(tb):
        x_b = x_ref[b]                                  # (C, hw_t)
        e_b = emb_ref[b]                                # (2, C)
        p = jnp.dot(e_b, x_b, preferred_element_type=jnp.float32)  # (2, hw_t)
        font_rows.append(p[0:1, :])                     # keep-rank slices
        char_rows.append(p[1:2, :])
    # Pack rows and store once per head: sublane/lane-dense (tb, hw_t) blocks.
    font_ref[...] = jnp.concatenate(font_rows, axis=0).astype(font_ref.dtype)
    char_ref[...] = jnp.concatenate(char_rows, axis=0).astype(char_ref.dtype)


# ------------------------------- wrapper -------------------------------------
def _choose_hw_tile(C, HW, tb, budget_bytes, itemsize, n_batch_blocks):
    """Lane tile: largest multiple of 128 with tb*C*hw_t*itemsize <= budget.

    hw_t does NOT have to divide HW -- the grid uses pl.cdiv and Pallas masks
    the ragged edge block. If the budget covers all of HW, a single
    full-extent lane block is used (always legal, even if HW % 128 != 0).
    """
    if HW <= 128:
        return HW
    max_lanes = budget_bytes // max(1, tb * C * itemsize)
    hw_t = max(128, (max_lanes // 128) * 128)
    if hw_t >= HW:
        hw_t = HW
        # v7x megacore: with a single batch block, split HW so the grid has
        # >= 2 parallel steps and both TensorCores get work.
        if n_batch_blocks == 1 and HW > 256:
            half = (((HW + 1) // 2) + 127) // 128 * 128
            hw_t = HW if half >= HW else max(128, half)
    return int(hw_t)


def projection_discriminator_forward(x, font_emb, char_emb, *,
                                     tile_b=8,
                                     x_block_budget=8 * 1024 * 1024,
                                     compute_dtype=jnp.bfloat16,
                                     vmem_limit_bytes=48 * 1024 * 1024):
    """Multi-task projection head.

    x: [B, C, H, W]; font_emb / char_emb: [B, C] (already gathered rows).
    Returns (font_out, char_out), each [B, 1, H, W] float32.
    """
    B, C, H, W = x.shape
    HW = H * W

    # The kernel is HBM-bound on reading x; feeding it as bf16 halves that
    # traffic (MXU takes bf16 with f32 accumulation on v5e/v6e/v7x).
    x_flat = x.reshape(B, C, HW).astype(compute_dtype)            # free reshape
    emb = jnp.stack([font_emb, char_emb], axis=1).astype(compute_dtype)  # (B,2,C)

    tb = int(min(tile_b, B))                   # <=8 rows; ==B when B<8 (legal full dim)
    n_b = pl.cdiv(B, tb)                       # ragged last block masked (no jnp.pad)
    itemsize = jnp.dtype(compute_dtype).itemsize
    hw_t = _choose_hw_tile(C, HW, tb, x_block_budget, itemsize, n_b)
    grid = (n_b, pl.cdiv(HW, hw_t))

    out_sds = jax.ShapeDtypeStruct((B, HW), jnp.float32)

    cost = pl.CostEstimate(
        flops=4 * B * C * HW,                                  # 2 heads x 2*B*C*HW
        transcendentals=0,
        bytes_accessed=(B * C * HW + 2 * B * C) * itemsize + 2 * B * HW * 4)

    grid_spec = pltpu.PrefetchScalarGridSpec(
        num_scalar_prefetch=0,
        grid=grid,
        in_specs=[
            # per-step feature slab: tb rows x full C x one HW lane tile
            pl.BlockSpec((tb, C, hw_t), lambda i, j: (i, 0, j)),
            # stacked embeddings for the same rows (tiny)
            pl.BlockSpec((tb, 2, C), lambda i, j: (i, 0, 0)),
        ],
        out_specs=(
            pl.BlockSpec((tb, hw_t), lambda i, j: (i, j)),     # font
            pl.BlockSpec((tb, hw_t), lambda i, j: (i, j)),     # char
        ),
    )

    font_out, char_out = pl.pallas_call(
        functools.partial(_projection_kernel, tb=tb),
        out_shape=(out_sds, out_sds),
        grid_spec=grid_spec,
        compiler_params=pltpu.CompilerParams(
            dimension_semantics=("parallel", "parallel"),
            vmem_limit_bytes=vmem_limit_bytes),
        cost_estimate=cost,
    )(x_flat, emb)

    # Free reshapes (outputs are already dense (B, HW) row-major).
    return font_out.reshape(B, 1, H, W), char_out.reshape(B, 1, H, W)


# ------------------------------ glue (plain JAX) -----------------------------
def spectral_normalize(w, n_iters=5):
    """Deterministic spectral norm (power iteration): W / sigma_max(W).
    Approximates torch.nn.utils.spectral_norm's inference behavior (torch
    keeps a stateful 1-iteration u estimate, so outputs aren't bit-matched)."""
    u = jnp.ones((w.shape[0],), jnp.float32) / jnp.sqrt(w.shape[0])
    v = None
    for _ in range(n_iters):
        v = w.T @ u
        v = v / (jnp.linalg.norm(v) + 1e-12)
        u = w @ v
        u = u / (jnp.linalg.norm(u) + 1e-12)
    sigma = u @ (w @ v)
    return w / sigma


def _run_case(key, B, C, H, W, n_fonts, n_chars, **kw):
    kx, kf, kc, kfi, kci = jax.random.split(key, 5)
    # TODO(synk): `feats` / `gap` are undefined in the spec; x stands in for
    # their output feature map.
    x = jax.random.normal(kx, (B, C, H, W), dtype=jnp.float32)
    font_table = spectral_normalize(
        jax.random.normal(kf, (n_fonts, C), jnp.float32))
    char_table = spectral_normalize(
        jax.random.normal(kc, (n_chars, C), jnp.float32))
    font_indice = jax.random.randint(kfi, (B,), 0, n_fonts)
    char_indice = jax.random.randint(kci, (B,), 0, n_chars)

    # Embedding lookup (gather) is glue; the projection reduction is the kernel.
    font_emb = font_table[font_indice]   # [B, C]
    char_emb = char_table[char_indice]   # [B, C]

    font_out, char_out = projection_discriminator_forward(x, font_emb, char_emb, **kw)
    jax.block_until_ready(font_out)
    jax.block_until_ready(char_out)

    # Reference with the same quantized inputs (f32 accumulation). Tolerance
    # is loose enough to absorb XLA's default matmul-precision choice on TPU.
    cdt = kw.get("compute_dtype", jnp.bfloat16)
    xq = x.astype(cdt).astype(jnp.float32)
    feq = font_emb.astype(cdt).astype(jnp.float32)
    ceq = char_emb.astype(cdt).astype(jnp.float32)
    ref_font = jnp.einsum('bchw,bc->bhw', xq, feq)[:, None]
    ref_char = jnp.einsum('bchw,bc->bhw', xq, ceq)[:, None]
    assert font_out.shape == (B, 1, H, W) and char_out.shape == (B, 1, H, W)
    assert jnp.allclose(font_out, ref_font, atol=1e-3, rtol=1e-3)
    assert jnp.allclose(char_out, ref_char, atol=1e-3, rtol=1e-3)


if __name__ == "__main__":
    key = jax.random.PRNGKey(0)
    k1, k2, k3 = jax.random.split(key, 3)

    # Spec-consistent small shape, default bf16-fed path.
    _run_case(k1, B=2, C=8, H=16, W=16, n_fonts=10, n_chars=12)

    # f32-fed path (same kernel, compute_dtype=f32).
    _run_case(k2, B=2, C=8, H=16, W=16, n_fonts=10, n_chars=12,
              compute_dtype=jnp.float32)

    # Ragged batch (B % tile_b != 0) + tiled HW: exercises the cdiv grid with
    # masked edge blocks (the replacement for the old jnp.pad copy).
    _run_case(k3, B=10, C=8, H=16, W=16, n_fonts=10, n_chars=12,
              x_block_budget=16 * 1024)   # force hw_t=128 -> 2 lane tiles

    print("KERNEL_OK")
</pallas_src>

<mosaic_0001>
module attributes {stable_mosaic.version = 11 : i64} {
  func.func @_projection_kernel(%arg0: i32, %arg1: i32, %arg2: memref<2x8x256xbf16, #tpu.memory_space<vmem>>, %arg3: memref<2x2x8xbf16, #tpu.memory_space<vmem>>, %arg4: memref<2x256xf32, #tpu.memory_space<vmem>>, %arg5: memref<2x256xf32, #tpu.memory_space<vmem>>) attributes {dimension_semantics = [#tpu.dimension_semantics<parallel>, #tpu.dimension_semantics<parallel>], iteration_bounds = array<i64: 1, 1>, scalar_prefetch = 0 : i64, scratch_operands = 0 : i64, tpu.core_type = #tpu.core_type<tc>, window_params = [{transform_indices = @transform_0, window_bounds = array<i64: 2, 8, 256>}, {transform_indices = @transform_1, window_bounds = array<i64: 2, 2, 8>}, {transform_indices = @transform_2, window_bounds = array<i64: 2, 256>}, {transform_indices = @transform_3, window_bounds = array<i64: 2, 256>}]} {
    %c0 = arith.constant 0 : index
    %c0_0 = arith.constant 0 : index
    %c0_1 = arith.constant 0 : index
    %0 = vector.load %arg2[%c0, %c0_0, %c0_1] : memref<2x8x256xbf16, #tpu.memory_space<vmem>>, vector<1x8x256xbf16>
    %1 = vector.shape_cast %0 : vector<1x8x256xbf16> to vector<8x256xbf16>
    %c0_2 = arith.constant 0 : index
    %c0_3 = arith.constant 0 : index
    %c0_4 = arith.constant 0 : index
    %2 = vector.load %arg3[%c0_2, %c0_3, %c0_4] : memref<2x2x8xbf16, #tpu.memory_space<vmem>>, vector<1x2x8xbf16>
    %3 = vector.shape_cast %2 : vector<1x2x8xbf16> to vector<2x8xbf16>
    %cst = arith.constant dense<0.000000e+00> : vector<2x256xf32>
    %4 = tpu.matmul %3, %1, %cst {dimension_numbers = #tpu.dot_dimension_numbers<[1], [0], [0], [1], [0, 0, 1, 1], [], []>} : vector<2x8xbf16>, vector<8x256xbf16>, vector<2x256xf32> -> vector<2x256xf32>
    %5 = vector.extract_strided_slice %4 {offsets = [0, 0], sizes = [1, 256], strides = [1, 1]} : vector<2x256xf32> to vector<1x256xf32>
    %6 = vector.extract_strided_slice %4 {offsets = [1, 0], sizes = [1, 256], strides = [1, 1]} : vector<2x256xf32> to vector<1x256xf32>
    %c1 = arith.constant 1 : index
    %c0_5 = arith.constant 0 : index
    %c0_6 = arith.constant 0 : index
    %7 = vector.load %arg2[%c1, %c0_5, %c0_6] : memref<2x8x256xbf16, #tpu.memory_space<vmem>>, vector<1x8x256xbf16>
    %8 = vector.shape_cast %7 : vector<1x8x256xbf16> to vector<8x256xbf16>
    %c1_7 = arith.constant 1 : index
    %c0_8 = arith.constant 0 : index
    %c0_9 = arith.constant 0 : index
    %9 = vector.load %arg3[%c1_7, %c0_8, %c0_9] : memref<2x2x8xbf16, #tpu.memory_space<vmem>>, vector<1x2x8xbf16>
    %10 = vector.shape_cast %9 : vector<1x2x8xbf16> to vector<2x8xbf16>
    %cst_10 = arith.constant dense<0.000000e+00> : vector<2x256xf32>
    %11 = tpu.matmul %10, %8, %cst_10 {dimension_numbers = #tpu.dot_dimension_numbers<[1], [0], [0], [1], [0, 0, 1, 1], [], []>} : vector<2x8xbf16>, vector<8x256xbf16>, vector<2x256xf32> -> vector<2x256xf32>
    %12 = vector.extract_strided_slice %11 {offsets = [0, 0], sizes = [1, 256], strides = [1, 1]} : vector<2x256xf32> to vector<1x256xf32>
    %13 = vector.extract_strided_slice %11 {offsets = [1, 0], sizes = [1, 256], strides = [1, 1]} : vector<2x256xf32> to vector<1x256xf32>
    %14 = tpu.concatenate %5, %12 in 0 : vector<1x256xf32>, vector<1x256xf32> -> vector<2x256xf32>
    %c0_11 = arith.constant 0 : index
    %c0_12 = arith.constant 0 : index
    %15 = vector.load %arg4[%c0_11, %c0_12] : memref<2x256xf32, #tpu.memory_space<vmem>>, vector<2x256xf32>
    tpu.vector_store %arg4[%c0_11, %c0_12], %14 {strides = array<i32>} : memref<2x256xf32, #tpu.memory_space<vmem>>, vector<2x256xf32>,
    %16 = tpu.concatenate %6, %13 in 0 : vector<1x256xf32>, vector<1x256xf32> -> vector<2x256xf32>
    %c0_13 = arith.constant 0 : index
    %c0_14 = arith.constant 0 : index
    %17 = vector.load %arg5[%c0_13, %c0_14] : memref<2x256xf32, #tpu.memory_space<vmem>>, vector<2x256xf32>
    tpu.vector_store %arg5[%c0_13, %c0_14], %16 {strides = array<i32>} : memref<2x256xf32, #tpu.memory_space<vmem>>, vector<2x256xf32>,
    return
  }
  func.func @transform_0(%arg0: i32, %arg1: i32) -> (i32, i32, i32) {
    %c0_i32 = arith.constant 0 : i32
    %c0_i32_0 = arith.constant 0 : i32
    return %arg0, %c0_i32, %arg1 : i32, i32, i32
  }
  func.func @transform_1(%arg0: i32, %arg1: i32) -> (i32, i32, i32) {
    %c0_i32 = arith.constant 0 : i32
    %c0_i32_0 = arith.constant 0 : i32
    %c0_i32_1 = arith.constant 0 : i32
    return %arg0, %c0_i32, %c0_i32_0 : i32, i32, i32
  }
  func.func @transform_2(%arg0: i32, %arg1: i32) -> (i32, i32) {
    %c0_i32 = arith.constant 0 : i32
    return %arg0, %arg1 : i32, i32
  }
  func.func @transform_3(%arg0: i32, %arg1: i32) -> (i32, i32) {
    %c0_i32 = arith.constant 0 : i32
    return %arg0, %arg1 : i32, i32
  }
}

</mosaic_0001>

<bundles_post_ra>
// kernel: tpu_custom_call.1
= control target key start
LH: loop header
LB: loop body
LE: loop exit
PB: predicated region body
PF: predicated region fallthrough
CT: control target
= control target key end

     0   :  { %9 = vsyncpa [#allocation3], 0  ;;  %s383_s0 = inlined_call_operand.hbm [shape: bf16[2,8,256], index: 0, kind: input, shape index: {}]   ;;  %s384_s1 = inlined_call_operand.vmem [shape: bf16[2,2,8], index: 1, kind: input, shape index: {}]   ;;  %s385_s2 = inlined_call_operand.hbm [shape: f32[2,256], index: 2, kind: output, shape index: {0}]   ;;  %s386_s3 = inlined_call_operand.hbm [shape: f32[2,256], index: 3, kind: output, shape index: {1}]  }
   0x1   :  { %10 = vsyncpa [#allocation4], 0 }
   0x2   :  { %11 = vsyncpa [#allocation7], 0  ;;  %s311_s12 = smov [#allocation2]   ;;  %s239_s16 = scalar_lea.hbm %s383_s0, 256 }
   0x3   :  { %s17_s13 = sshll.u32 %s311_s12, 4  ;;  %p240_p0 = scmp.ne.s32.totalorder %s383_s0, %s239_s16  ;;  %s18_s13 = int_to_ptr.vmem [resolvable:$true] %s17_s13 }
   0x4   :  { %p243_p1 = scmp.lt.u32.totalorder %s239_s16, %s383_s0 }
   0x6   :  { %p245_p2 = pnand %p243_p1, %p240_p0 }
   0x8   :  { %248 = shalt.err (!%p245_p2)
}
   0x9   :  { %s249_s21 = scalar_lea.vmem %s18_s13, 256  ;;  %p254_p4 = scmp.lt.s32.totalorder %s18_s13, %s18_s13 }
   0xa   :  { %p250_p3 = scmp.ne.s32.totalorder %s18_s13, %s249_s21  ;;  %p255_p5 = scmp.lt.s32.totalorder %s249_s21, %s249_s21 }
   0xc   :  { %p256_p6 = por %p255_p5, %p254_p4 }
   0xe   :  { %p257_p7 = pnand %p256_p6, %p250_p3 }
  0x10   :  { %260 = shalt.err (!%p257_p7)
}
  0x11   :  { %s312_s22 = smov 128   ;;  %s313_s23 = smov 8  }
  0x12   :  { %23 = dma.hbm_to_vmem [thread:$0]  %s383_s0, 256, %s18_s13, [#allocation3], %s312_s22, %s312_s22, %s313_s23  }
  0x13   :  { %305 = dma.done.wait [#allocation3], 256  }
  0x14   :  { %306 = vsyncadd [#allocation3], 4294967040  ;;  %v314_v0 = vmov 0   ;;  %v30_v1 = vld [vmem:[#allocation2] sm:$0xff]  ;;  %vm41_vm0 = vcmask 1043456   ;;  %v90_v2 = vld [vmem:[#allocation2 + $0x8] sm:$0xff] }
  0x15   :  { %80 = vmatprep.mubr.bf16.mxu0 %v314_v0  ;;  %139 = vmatprep.mubr.bf16.mxu1 %v314_v0  ;;  %v219_v3 = vcombine.high %v30_v1, %v30_v1  ;;  %v224_v4 = vcombine.high %v90_v2, %v90_v2  ;;  %v218_v5 = vcombine.low %v30_v1, %v30_v1  ;;  %v31_v9 = vld [vmem:[%s384_s1] sm:$0x1]  ;;  %vm37_vm1 = vcmask 64512   ;;  %v222_v10 = vld [vmem:[%s384_s1 + $0x1] sm:$0x1]  ;;  %s315_s29 = smov [#allocation5]  }
  0x16   :  { %v223_v6 = vcombine.low %v90_v2, %v90_v2  ;;  %vm154_vm2 = vcmask 1040384   ;;  %s195_s30 = sshll.u32 %s315_s29, 4  ;;  %s316_s1 = smov [#allocation6]   ;;  %s196_s30 = int_to_ptr.vmem [resolvable:$true] %s195_s30 }
  0x17   :  { %220 = vmatprep.subr.msk.bf16.mxu0 %vm41_vm0, %v219_v3  ;;  %225 = vmatprep.subr.msk.bf16.mxu1 %vm41_vm0, %v224_v4  ;;  %v43_v7 = vsel %vm41_vm0, %v218_v5, 0  ;;  %s205_s4 = sshll.u32 %s316_s1, 4  ;;  %s261_s5 = scalar_lea.vmem %s196_s30, 64  ;;  %s206_s4 = int_to_ptr.vmem [resolvable:$true] %s205_s4 }
  0x18   :  { %v102_v8 = vsel %vm41_vm0, %v223_v6, 0  ;;  %49 = vmatpush1.bf16.msra.mxu0 %v43_v7  ;;  %p262_p8 = scmp.ne.s32.totalorder %s196_s30, %s261_s5  ;;  %p266_p9 = scmp.lt.s32.totalorder %s196_s30, %s196_s30 }
  0x19   :  { %108 = vmatpush1.bf16.msra.mxu1 %v102_v8  ;;  %p267_p10 = scmp.lt.s32.totalorder %s261_s5, %s261_s5 }
  0x1b   :  { %221 = vmatmul.mubr.msk.bf16.vlgmr.msra.gmra.mrb[0].mxu0 %vm37_vm1, %v31_v9  ;;  %p268_p11 = por %p267_p10, %p266_p9 }
  0x1c   :  { %226 = vmatmul.mubr.msk.bf16.vlgmr.msra.gmra.mrb[0].mxu1 %vm37_vm1, %v222_v10 }
  0x1d   :  { %p269_p12 = pnand %p268_p11, %p262_p8 }
  0xee   :  { %v82_v11 = vpop.f32.mrb[0].mxu0 }
  0xef   :  { %v141_v12 = vpop.f32.mrb[0].mxu1  ;;  %v171_v13 = vrot.slane %v82_v11, 1  ;;  %v84_v15 = vpop.f32.mrb[1].mxu0 }
  0xf0   :  { %v150_v14 = vrot.slane %v141_v12, 7  ;;  %v143_v16 = vpop.f32.mrb[1].mxu1  ;;  %v172_v17 = vrot.slane %v84_v15, 1  ;;  %v86_v19 = vpop.f32.mrb[2].mxu0 }
  0xf1   :  { %v151_v18 = vrot.slane %v143_v16, 7  ;;  %v145_v20 = vpop.f32.mrb[2].mxu1  ;;  %v175_v21 = vsel %vm154_vm2, %v171_v13, %v141_v12  ;;  %v87_v22 = vpop.f32.mrb[3].mxu0 }
  0xf2   :  { %v146_v23 = vpop.f32.mrb[3].mxu1  ;;  %v155_v24 = vsel %vm154_vm2, %v82_v11, %v150_v14  ;;  %v176_v25 = vsel %vm154_vm2, %v172_v17, %v143_v16 }
  0xf3   :  { %v156_v26 = vsel %vm154_vm2, %v84_v15, %v151_v18  ;;  %v179_v27 = vcombine.low %v175_v21, %v176_v25 }
  0xf4   :  { %v159_v28 = vcombine.low %v155_v24, %v156_v26 }
  0xf5   :  { %228 = vst.sshfl [vmem:[#allocation6] sm:$0x33 pattern:$0x76325410] %v179_v27 }
  0xf6   :  { %227 = vst.sshfl [vmem:[#allocation5] sm:$0x33 pattern:$0x76325410] %v159_v28 }
  0xf7   :  { %272 = shalt.err (!%p269_p12)
}
  0xf8   :  { %s273_s8 = scalar_lea.hbm %s385_s2, 64 }
  0xf9   :  { %p274_p13 = scmp.ne.s32.totalorder %s385_s2, %s273_s8  ;;  %p277_p0 = scmp.lt.u32.totalorder %s273_s8, %s385_s2 }
  0xfb   :  { %p279_p1 = pnand %p277_p0, %p274_p13 }
  0xfd   :  { %282 = shalt.err (!%p279_p1)
}
  0xfe   :  { %198 = dma.vmem_to_hbm [thread:$0]  %s196_s30, 64, %s385_s2, [#allocation4]  }
  0xff   :  { %s283_s15 = scalar_lea.vmem %s206_s4, 64  ;;  %p288_p3 = scmp.lt.s32.totalorder %s206_s4, %s206_s4 }
 0x100   :  { %p284_p2 = scmp.ne.s32.totalorder %s206_s4, %s283_s15  ;;  %p289_p4 = scmp.lt.s32.totalorder %s283_s15, %s283_s15 }
 0x102   :  { %p290_p5 = por %p289_p4, %p288_p3 }
 0x104   :  { %p291_p6 = pnand %p290_p5, %p284_p2 }
 0x106   :  { %294 = shalt.err (!%p291_p6)
}
 0x107   :  { %s295_s18 = scalar_lea.hbm %s386_s3, 64 }
 0x108   :  { %p296_p7 = scmp.ne.s32.totalorder %s386_s3, %s295_s18  ;;  %p299_p8 = scmp.lt.u32.totalorder %s295_s18, %s386_s3 }
 0x10a   :  { %p301_p9 = pnand %p299_p8, %p296_p7 }
 0x10c   :  { %304 = shalt.err (!%p301_p9)
}
 0x10d   :  { %208 = dma.vmem_to_hbm [thread:$0]  %s206_s4, 64, %s386_s3, [#allocation7]  }
 0x10e   :  { %307 = dma.done.wait [#allocation4], 64  }
 0x10f   :  { %308 = vsyncadd [#allocation4], 4294967232 }
 0x110   :  { %309 = dma.done.wait [#allocation7], 64  }
 0x111   :  { %310 = vsyncadd [#allocation7], 4294967232 }
 0x112   :  { %215 = vsyncpa [#allocation3], 1 }
 0x113   :  { %216 = vsyncpa [#allocation4], 1 }
 0x114   :  { %217 = vsyncpa [#allocation7], 1 }

</bundles_post_ra>
